<compile_context>
chip_gen: v6e
topology: v6e:2x2x1
jax: 0.10.0
libtpu: 0.0.40
codegen_flags: <defaults>
</compile_context>

<pallas_src>
import jax
import jax.numpy as jnp
from jax import lax
from jax.experimental import pallas as pl
from jax.experimental.pallas import tpu as pltpu

EMBEDDING_DIM = 16
EMBED_MAX_NORM = 1.0
# TODO(synk): HERO_TRANSFORM is not available here; use a synthetic vocab size.
VOCAB_SIZE = 128
N_CTX = 9          # asserted in the torch forward
N_ALLIED = 4
N_ENEMY = 5


def _cbow_kernel(ids_ref, m_ref, bias_ref, out_ref):
    """Fused CBOW forward for one batch tile.

    ids_ref  : (TB, 9)   int32  context hero ids (lane-major)
    m_ref    : (2V, V)   f32    stacked folded weight [emb@Wa.T/4 ; emb@We.T/5]
    bias_ref : (1, V)    f32    head bias
    out_ref  : (TB, V)          logits
    """
    TB, V = out_ref.shape

    ids = ids_ref[...]                                        # (TB, 9) int32
    vocab = lax.broadcasted_iota(jnp.int32, (TB, V), 1)       # (TB, V) vocab ids

    # Multiplicity counts per group. Accumulate in int32 (cheap select per
    # compare), cast to f32 once per group.
    allied_cnt = jnp.zeros((TB, V), jnp.int32)
    for j in range(N_ALLIED):
        allied_cnt = allied_cnt + (vocab == ids[:, j:j + 1]).astype(jnp.int32)
    enemy_cnt = jnp.zeros((TB, V), jnp.int32)
    for j in range(N_ALLIED, N_CTX):
        enemy_cnt = enemy_cnt + (vocab == ids[:, j:j + 1]).astype(jnp.int32)

    # Stack counts along lanes -> single (TB, 2V) operand for one K=2V
    # contraction (full MXU depth on v6e/v7x; two 128-deep passes on v5e).
    cnt = jnp.concatenate(
        [allied_cnt.astype(jnp.float32), enemy_cnt.astype(jnp.float32)], axis=1)

    logits = jnp.dot(cnt, m_ref[...], preferred_element_type=jnp.float32)
    out_ref[...] = (logits + bias_ref[...]).astype(out_ref.dtype)


def _choose_batch_tile(batch):
    """Batch tile (multiple of 8, <= 512 rows) and padded batch size.

    When batch > 8 the tile targets ~half the batch so the 'parallel' grid axis
    has length >= 2 and can split across v7x's two TensorCores.
    """
    if batch <= 8:
        tb = 8
    else:
        half = -(-batch // 2)                      # cdiv(batch, 2)
        tb = min(512, ((half + 7) // 8) * 8)       # round up to sublane multiple
    b_pad = -(-batch // tb) * tb
    return tb, b_pad


def cbow_forward(ctx_heroes, t_emb, head_w, head_b, *, out_dtype=jnp.float32):
    """ctx_heroes: (B, 9) int; t_emb: (V, D); head_w: (V, 2D); head_b: (V,).
    Returns (B, V) logits (f32 by default; pass out_dtype=jnp.bfloat16 to halve
    output writeback bytes at the cost of diverging from torch's f32 output)."""
    B, n_ctx = ctx_heroes.shape
    assert n_ctx == N_CTX
    V, D = t_emb.shape

    # Hoisted nn.Embedding(max_norm=1) renorm (constant for a given table;
    # torch eps semantics: scale = max_norm / (norm + 1e-7) where norm > max_norm).
    # TODO(synk): torch also mutates the stored embedding rows in place at lookup
    # time; that training-time side effect is not reproduced (inference only).
    norm = jnp.sqrt(jnp.sum(t_emb * t_emb, axis=1, keepdims=True))
    scale = jnp.where(norm > EMBED_MAX_NORM,
                      EMBED_MAX_NORM / (norm + 1e-7),
                      jnp.ones_like(norm))
    emb_c = (t_emb * scale).astype(jnp.float32)

    # Constant-fold embedding table into the head (batch-independent, so free
    # at steady state).  Group means fold into the 1/4 and 1/5 scales.
    w_a = head_w[:, :D].astype(jnp.float32)                    # (V, D) allied half
    w_e = head_w[:, D:].astype(jnp.float32)                    # (V, D) enemy half
    m_a = (emb_c @ w_a.T) * jnp.float32(1.0 / N_ALLIED)        # (V, V)
    m_e = (emb_c @ w_e.T) * jnp.float32(1.0 / N_ENEMY)         # (V, V)
    m_stacked = jnp.concatenate([m_a, m_e], axis=0)            # (2V, V)

    bias = head_b.reshape(1, V).astype(jnp.float32)
    ids = ctx_heroes.astype(jnp.int32)                         # (B, 9), lane-major
    # TODO(synk): out-of-range hero ids silently contribute zero here, whereas
    # torch's Embedding would raise; validate ids upstream if needed.

    tb, b_pad = _choose_batch_tile(B)
    if b_pad != B:
        ids = jnp.pad(ids, ((0, b_pad - B), (0, 0)))           # padded rows use id 0
    grid = (b_pad // tb,)

    out = pl.pallas_call(
        _cbow_kernel,
        out_shape=jax.ShapeDtypeStruct((b_pad, V), out_dtype),
        grid_spec=pltpu.PrefetchScalarGridSpec(
            num_scalar_prefetch=0,
            grid=grid,
            in_specs=[
                pl.BlockSpec((tb, N_CTX), lambda i: (i, 0)),    # ids, batch-tiled
                pl.BlockSpec((2 * V, V), lambda i: (0, 0)),     # folded weight (resident)
                pl.BlockSpec((1, V), lambda i: (0, 0)),         # bias (resident)
            ],
            out_specs=pl.BlockSpec((tb, V), lambda i: (i, 0)),  # lane-dense output
        ),
        compiler_params=pltpu.CompilerParams(
            dimension_semantics=("parallel",)),
    )(ids, m_stacked, bias)

    return out[:B]


def cbow_reference(ctx_heroes, t_emb, head_w, head_b):
    """Pure-JAX reference mirroring the torch forward."""
    norm = jnp.sqrt(jnp.sum(t_emb * t_emb, axis=1, keepdims=True))
    scale = jnp.where(norm > EMBED_MAX_NORM, EMBED_MAX_NORM / (norm + 1e-7), 1.0)
    emb_c = t_emb * scale
    all_embeds = emb_c[ctx_heroes]                        # (B, 9, D)
    allied = all_embeds[:, :N_ALLIED].mean(axis=-2)
    enemy = all_embeds[:, N_ALLIED:].mean(axis=-2)
    ctx = jnp.concatenate([allied, enemy], axis=-1)
    return ctx @ head_w.T + head_b


if __name__ == "__main__":
    key = jax.random.PRNGKey(0)
    k_ids, k_emb, k_w, k_b = jax.random.split(key, 4)

    # Deterministic parameter init (shapes from the module's __init__).
    t_emb = jax.random.normal(k_emb, (VOCAB_SIZE, EMBEDDING_DIM), dtype=jnp.float32)
    bound = 1.0 / jnp.sqrt(2.0 * EMBEDDING_DIM)
    head_w = jax.random.uniform(k_w, (VOCAB_SIZE, 2 * EMBEDDING_DIM),
                                minval=-bound, maxval=bound, dtype=jnp.float32)
    head_b = jax.random.uniform(k_b, (VOCAB_SIZE,),
                                minval=-bound, maxval=bound, dtype=jnp.float32)
    # Note: c_embs exists in __init__ but is unused in forward; omitted.

    # Small case (B=2): single 8-row tile.
    B = 2
    ctx_heroes = jax.random.randint(k_ids, (B, N_CTX), 0, VOCAB_SIZE, dtype=jnp.int32)
    out = jax.block_until_ready(cbow_forward(ctx_heroes, t_emb, head_w, head_b))
    ref = cbow_reference(ctx_heroes, t_emb, head_w, head_b)
    assert out.shape == (B, VOCAB_SIZE)
    assert jnp.allclose(out, ref, atol=1e-4, rtol=1e-4), "mismatch vs reference (B=2)"

    # Non-multiple-of-8 batch: exercises padding + multi-tile grid (grid >= 2).
    B2 = 20
    ctx_heroes2 = jax.random.randint(jax.random.PRNGKey(1), (B2, N_CTX), 0,
                                     VOCAB_SIZE, dtype=jnp.int32)
    out2 = jax.block_until_ready(cbow_forward(ctx_heroes2, t_emb, head_w, head_b))
    ref2 = cbow_reference(ctx_heroes2, t_emb, head_w, head_b)
    assert out2.shape == (B2, VOCAB_SIZE)
    assert jnp.allclose(out2, ref2, atol=1e-4, rtol=1e-4), "mismatch vs reference (B=20)"

    print("KERNEL_OK")
</pallas_src>

<mosaic_0001>
module attributes {stable_mosaic.version = 11 : i64} {
  func.func @_cbow_kernel(%arg0: i32, %arg1: memref<8x9xi32, #tpu.memory_space<vmem>>, %arg2: memref<256x128xf32, #tpu.memory_space<vmem>>, %arg3: memref<1x128xf32, #tpu.memory_space<vmem>>, %arg4: memref<8x128xf32, #tpu.memory_space<vmem>>) attributes {dimension_semantics = [#tpu.dimension_semantics<parallel>], iteration_bounds = array<i64: 1>, scalar_prefetch = 0 : i64, scratch_operands = 0 : i64, tpu.core_type = #tpu.core_type<tc>, window_params = [{transform_indices = @transform_0, window_bounds = array<i64: 8, 9>}, {pipeline_mode = #tpu.pipeline_mode<synchronous>, transform_indices = @transform_1, window_bounds = array<i64: 256, 128>}, {pipeline_mode = #tpu.pipeline_mode<synchronous>, transform_indices = @transform_2, window_bounds = array<i64: 1, 128>}, {transform_indices = @transform_3, window_bounds = array<i64: 8, 128>}]} {
    %c0 = arith.constant 0 : index
    %c0_0 = arith.constant 0 : index
    %0 = vector.load %arg1[%c0, %c0_0] : memref<8x9xi32, #tpu.memory_space<vmem>>, vector<8x9xi32>
    %1 = tpu.iota {dimensions = array<i32: 1>} : vector<8x128xi32>
    %c0_i32 = arith.constant 0 : i32
    %2 = vector.broadcast %c0_i32 : i32 to vector<8x128xi32>
    %3 = vector.extract_strided_slice %0 {offsets = [0, 0], sizes = [8, 1], strides = [1, 1]} : vector<8x9xi32> to vector<8x1xi32>
    %4 = vector.broadcast %3 : vector<8x1xi32> to vector<8x128xi32>
    %5 = arith.cmpi eq, %1, %4 : vector<8x128xi32>
    %6 = arith.extui %5 : vector<8x128xi1> to vector<8x128xi32>
    %7 = arith.addi %2, %6 : vector<8x128xi32>
    %8 = vector.extract_strided_slice %0 {offsets = [0, 1], sizes = [8, 1], strides = [1, 1]} : vector<8x9xi32> to vector<8x1xi32>
    %9 = vector.broadcast %8 : vector<8x1xi32> to vector<8x128xi32>
    %10 = arith.cmpi eq, %1, %9 : vector<8x128xi32>
    %11 = arith.extui %10 : vector<8x128xi1> to vector<8x128xi32>
    %12 = arith.addi %7, %11 : vector<8x128xi32>
    %13 = vector.extract_strided_slice %0 {offsets = [0, 2], sizes = [8, 1], strides = [1, 1]} : vector<8x9xi32> to vector<8x1xi32>
    %14 = vector.broadcast %13 : vector<8x1xi32> to vector<8x128xi32>
    %15 = arith.cmpi eq, %1, %14 : vector<8x128xi32>
    %16 = arith.extui %15 : vector<8x128xi1> to vector<8x128xi32>
    %17 = arith.addi %12, %16 : vector<8x128xi32>
    %18 = vector.extract_strided_slice %0 {offsets = [0, 3], sizes = [8, 1], strides = [1, 1]} : vector<8x9xi32> to vector<8x1xi32>
    %19 = vector.broadcast %18 : vector<8x1xi32> to vector<8x128xi32>
    %20 = arith.cmpi eq, %1, %19 : vector<8x128xi32>
    %21 = arith.extui %20 : vector<8x128xi1> to vector<8x128xi32>
    %22 = arith.addi %17, %21 : vector<8x128xi32>
    %c0_i32_1 = arith.constant 0 : i32
    %23 = vector.broadcast %c0_i32_1 : i32 to vector<8x128xi32>
    %24 = vector.extract_strided_slice %0 {offsets = [0, 4], sizes = [8, 1], strides = [1, 1]} : vector<8x9xi32> to vector<8x1xi32>
    %25 = vector.broadcast %24 : vector<8x1xi32> to vector<8x128xi32>
    %26 = arith.cmpi eq, %1, %25 : vector<8x128xi32>
    %27 = arith.extui %26 : vector<8x128xi1> to vector<8x128xi32>
    %28 = arith.addi %23, %27 : vector<8x128xi32>
    %29 = vector.extract_strided_slice %0 {offsets = [0, 5], sizes = [8, 1], strides = [1, 1]} : vector<8x9xi32> to vector<8x1xi32>
    %30 = vector.broadcast %29 : vector<8x1xi32> to vector<8x128xi32>
    %31 = arith.cmpi eq, %1, %30 : vector<8x128xi32>
    %32 = arith.extui %31 : vector<8x128xi1> to vector<8x128xi32>
    %33 = arith.addi %28, %32 : vector<8x128xi32>
    %34 = vector.extract_strided_slice %0 {offsets = [0, 6], sizes = [8, 1], strides = [1, 1]} : vector<8x9xi32> to vector<8x1xi32>
    %35 = vector.broadcast %34 : vector<8x1xi32> to vector<8x128xi32>
    %36 = arith.cmpi eq, %1, %35 : vector<8x128xi32>
    %37 = arith.extui %36 : vector<8x128xi1> to vector<8x128xi32>
    %38 = arith.addi %33, %37 : vector<8x128xi32>
    %39 = vector.extract_strided_slice %0 {offsets = [0, 7], sizes = [8, 1], strides = [1, 1]} : vector<8x9xi32> to vector<8x1xi32>
    %40 = vector.broadcast %39 : vector<8x1xi32> to vector<8x128xi32>
    %41 = arith.cmpi eq, %1, %40 : vector<8x128xi32>
    %42 = arith.extui %41 : vector<8x128xi1> to vector<8x128xi32>
    %43 = arith.addi %38, %42 : vector<8x128xi32>
    %44 = vector.extract_strided_slice %0 {offsets = [0, 8], sizes = [8, 1], strides = [1, 1]} : vector<8x9xi32> to vector<8x1xi32>
    %45 = vector.broadcast %44 : vector<8x1xi32> to vector<8x128xi32>
    %46 = arith.cmpi eq, %1, %45 : vector<8x128xi32>
    %47 = arith.extui %46 : vector<8x128xi1> to vector<8x128xi32>
    %48 = arith.addi %43, %47 : vector<8x128xi32>
    %49 = arith.sitofp %22 : vector<8x128xi32> to vector<8x128xf32>
    %50 = arith.sitofp %48 : vector<8x128xi32> to vector<8x128xf32>
    %51 = tpu.concatenate %49, %50 in 1 : vector<8x128xf32>, vector<8x128xf32> -> vector<8x256xf32>
    %c0_2 = arith.constant 0 : index
    %c0_3 = arith.constant 0 : index
    %52 = vector.load %arg2[%c0_2, %c0_3] : memref<256x128xf32, #tpu.memory_space<vmem>>, vector<256x128xf32>
    %cst = arith.constant dense<0.000000e+00> : vector<8x128xf32>
    %53 = tpu.matmul %51, %52, %cst {dimension_numbers = #tpu.dot_dimension_numbers<[1], [0], [0], [1], [0, 0, 1, 1], [], []>} : vector<8x256xf32>, vector<256x128xf32>, vector<8x128xf32> -> vector<8x128xf32>
    %c0_4 = arith.constant 0 : index
    %c0_5 = arith.constant 0 : index
    %54 = vector.load %arg3[%c0_4, %c0_5] : memref<1x128xf32, #tpu.memory_space<vmem>>, vector<1x128xf32>
    %55 = vector.broadcast %54 : vector<1x128xf32> to vector<8x128xf32>
    %56 = arith.addf %53, %55 : vector<8x128xf32>
    %c0_6 = arith.constant 0 : index
    %c0_7 = arith.constant 0 : index
    %57 = vector.load %arg4[%c0_6, %c0_7] : memref<8x128xf32, #tpu.memory_space<vmem>>, vector<8x128xf32>
    tpu.vector_store %arg4[%c0_6, %c0_7], %56 {strides = array<i32>} : memref<8x128xf32, #tpu.memory_space<vmem>>, vector<8x128xf32>,
    return
  }
  func.func @transform_0(%arg0: i32) -> (i32, i32) {
    %c0_i32 = arith.constant 0 : i32
    %c0_i32_0 = arith.constant 0 : i32
    return %arg0, %c0_i32 : i32, i32
  }
  func.func @transform_1(%arg0: i32) -> (i32, i32) {
    %c0_i32 = arith.constant 0 : i32
    %c0_i32_0 = arith.constant 0 : i32
    %c0_i32_1 = arith.constant 0 : i32
    return %c0_i32, %c0_i32_0 : i32, i32
  }
  func.func @transform_2(%arg0: i32) -> (i32, i32) {
    %c0_i32 = arith.constant 0 : i32
    %c0_i32_0 = arith.constant 0 : i32
    %c0_i32_1 = arith.constant 0 : i32
    return %c0_i32, %c0_i32_0 : i32, i32
  }
  func.func @transform_3(%arg0: i32) -> (i32, i32) {
    %c0_i32 = arith.constant 0 : i32
    %c0_i32_0 = arith.constant 0 : i32
    return %arg0, %c0_i32 : i32, i32
  }
}

</mosaic_0001>

<bundles_post_ra>
// kernel: tpu_custom_call.1
= control target key start
LH: loop header
LB: loop body
LE: loop exit
PB: predicated region body
PF: predicated region fallthrough
CT: control target
= control target key end

     0   :  { %8 = vsyncpa [#allocation3], 0  ;;  %s406_s0 = inlined_call_operand.hbm [shape: s32[8,9], index: 0, kind: input, shape index: {}]   ;;  %s407_s1 = inlined_call_operand.hbm [shape: f32[256,128], index: 1, kind: input, shape index: {}]   ;;  %s408_s2 = inlined_call_operand.vmem [shape: f32[1,128], index: 2, kind: input, shape index: {}]   ;;  %s409_s3 = inlined_call_operand.hbm [shape: f32[8,128], index: 3, kind: output, shape index: {}]  }
   0x1   :  { %9 = vsyncpa [#allocation6], 0 }
   0x2   :  { %10 = vsyncpa [#allocation4], 0  ;;  %s350_s12 = smov [#allocation2]   ;;  %s351_s14 = smov [#allocation5]  }
   0x3   :  { %s17_s13 = sshll.u32 %s350_s12, 4  ;;  %s26_s15 = sshll.u32 %s351_s14, 4  ;;  %s18_s13 = int_to_ptr.vmem [resolvable:$true] %s17_s13  ;;  %s27_s15 = int_to_ptr.vmem [resolvable:$true] %s26_s15 }
   0x4   :  { %s292_s16 = scalar_lea.vmem %s18_s13, 128  ;;  %p297_p1 = scmp.lt.s32.totalorder %s18_s13, %s18_s13 }
   0x5   :  { %p293_p0 = scmp.ne.s32.totalorder %s18_s13, %s292_s16  ;;  %p298_p2 = scmp.lt.s32.totalorder %s292_s16, %s292_s16 }
   0x7   :  { %p299_p3 = por %p298_p2, %p297_p1 }
   0x9   :  { %p300_p4 = pnand %p299_p3, %p293_p0 }
   0xb   :  { %303 = shalt.err (!%p300_p4)
}
   0xc   :  { %20 = dma.hbm_to_vmem [thread:$0]  %s406_s0, 128, %s18_s13, [#allocation3]  }
   0xd   :  { %s312_s19 = scalar_lea.vmem %s27_s15, 4096  ;;  %p317_p6 = scmp.lt.s32.totalorder %s27_s15, %s27_s15 }
   0xe   :  { %p313_p5 = scmp.ne.s32.totalorder %s27_s15, %s312_s19  ;;  %p318_p7 = scmp.lt.s32.totalorder %s312_s19, %s312_s19 }
  0x10   :  { %p319_p8 = por %p318_p7, %p317_p6 }
  0x12   :  { %p320_p9 = pnand %p319_p8, %p313_p5 }
  0x14   :  { %323 = shalt.err (!%p320_p9)
}
  0x15   :  { %s352_s20 = smov 128   ;;  %s353_s21 = smov 8  }
  0x16   :  { %32 = dma.hbm_to_vmem [thread:$0]  %s407_s1, 4096, %s27_s15, [#allocation6], %s352_s20, %s352_s20, %s353_s21  }
  0x17   :  { %344 = dma.done.wait [#allocation3], 128  }
  0x18   :  { %345 = vsyncadd [#allocation3], 4294967168 }
  0x19   :  { %346 = dma.done.wait [#allocation6], 4096  }
  0x1a   :  { %347 = vsyncadd [#allocation6], 4294963200  ;;  %v354_v0 = vmov 6   ;;  %v355_v1 = vmov 4   ;;  %v41_v2 = vld [vmem:[#allocation2] sm:$0xff]  ;;  %v128_v5 = vld [vmem:[#allocation5 + $0xf0] sm:$0xff]  ;;  %v42_v44 = vlaneseq }
  0x1b   :  { %276 = vset.pattern.permute.xlu1 %v354_v0  ;;  %274 = vset.pattern.permute.xlu0 %v355_v1  ;;  %v129_v3 = vld [vmem:[#allocation5 + $0xf8] sm:$0xff]  ;;  %v112_v6 = vld [vmem:[#allocation5 + $0x70] sm:$0xff]  ;;  %v356_v7 = vmov 0   ;;  %v357_v8 = vmov 5   ;;  %v127_v9 = vld [vmem:[#allocation5 + $0xe8] sm:$0xff]  ;;  %v358_v12 = vmov 1  }
  0x1c   :  { %v113_v4 = vld [vmem:[#allocation5 + $0x78] sm:$0xff]  ;;  %79 = vperm.xlu1 %276, %v41_v2   ;;  %68 = vperm.xlu0 %274, %v41_v2   ;;  %v111_v10 = vld [vmem:[#allocation5 + $0x68] sm:$0xff]  ;;  %v126_v11 = vld [vmem:[#allocation5 + $0xe0] sm:$0xff]  ;;  %v359_v13 = vmov 7   ;;  %v360_v17 = vmov 2   ;;  %v361_v18 = vmov 3  }
  0x1d   :  { %225 = vmatprep.subr.mxu0 %v129_v3  ;;  %v110_v14 = vld [vmem:[#allocation5 + $0x60] sm:$0xff]  ;;  %v125_v15 = vld [vmem:[#allocation5 + $0xd8] sm:$0xff]  ;;  %v124_v19 = vld [vmem:[#allocation5 + $0xd0] sm:$0xff]  ;;  %v362_v24 = vmov 8   ;;  %v43_v45 = vand.u32 127, %v42_v44  ;;  %s363_s24 = smov [#allocation7]  }
  0x1e   :  { %226 = vmatpush3.msra.mxu0 %v113_v4  ;;  %v109_v16 = vld [vmem:[#allocation5 + $0x58] sm:$0xff]  ;;  %v108_v20 = vld [vmem:[#allocation5 + $0x50] sm:$0xff]  ;;  %v123_v21 = vld [vmem:[#allocation5 + $0xc8] sm:$0xff]  ;;  %s214_s25 = sshll.u32 %s363_s24, 4  ;;  %s215_s25 = int_to_ptr.vmem [resolvable:$true] %s214_s25 }
  0x1f   :  { %227 = vmatprep.subr.mxu0 %v128_v5  ;;  %v107_v22 = vld [vmem:[#allocation5 + $0x48] sm:$0xff]  ;;  %v122_v23 = vld [vmem:[#allocation5 + $0xc0] sm:$0xff]  ;;  %v121_v26 = vld [vmem:[#allocation5 + $0xb8] sm:$0xff]  ;;  %s324_s26 = scalar_lea.vmem %s215_s25, 128  ;;  %p329_p11 = scmp.lt.s32.totalorder %s215_s25, %s215_s25 }
  0x20   :  { %277 = vset.pattern.permute.xlu1 %v356_v7  ;;  %275 = vset.pattern.permute.xlu0 %v357_v8  ;;  %v106_v25 = vld [vmem:[#allocation5 + $0x40] sm:$0xff]  ;;  %v105_v27 = vld [vmem:[#allocation5 + $0x38] sm:$0xff]  ;;  %v120_v28 = vld [vmem:[#allocation5 + $0xb0] sm:$0xff]  ;;  %p325_p10 = scmp.ne.s32.totalorder %s215_s25, %s324_s26  ;;  %p330_p12 = scmp.lt.s32.totalorder %s324_s26, %s324_s26 }
  0x21   :  { %45 = vperm.xlu1 %277, %v41_v2   ;;  %73 = vperm.xlu0 %275, %v41_v2   ;;  %v104_v29 = vld [vmem:[#allocation5 + $0x30] sm:$0xff]  ;;  %v119_v30 = vld [vmem:[#allocation5 + $0xa8] sm:$0xff]  ;;  %v118_v32 = vld [vmem:[#allocation5 + $0xa0] sm:$0xff] }
  0x22   :  { %228 = vmatpush3.msra.mxu0 %v112_v6  ;;  %v103_v31 = vld [vmem:[#allocation5 + $0x28] sm:$0xff]  ;;  %v102_v33 = vld [vmem:[#allocation5 + $0x20] sm:$0xff]  ;;  %v117_v34 = vld [vmem:[#allocation5 + $0x98] sm:$0xff]  ;;  %p331_p13 = por %p330_p12, %p329_p11 }
  0x23   :  { %229 = vmatprep.subr.mxu0 %v127_v9  ;;  %v101_v35 = vld [vmem:[#allocation5 + $0x18] sm:$0xff]  ;;  %v116_v36 = vld [vmem:[#allocation5 + $0x90] sm:$0xff]  ;;  %v115_v38 = vld [vmem:[#allocation5 + $0x88] sm:$0xff] }
  0x24   :  { %230 = vmatpush3.msra.mxu0 %v111_v10  ;;  %v100_v37 = vld [vmem:[#allocation5 + $0x10] sm:$0xff]  ;;  %v99_v39 = vld [vmem:[#allocation5 + $0x8] sm:$0xff]  ;;  %v114_v40 = vld [vmem:[#allocation5 + $0x80] sm:$0xff]  ;;  %p332_p0 = pnand %p331_p13, %p325_p10 }
  0x25   :  { %278 = vset.pattern.permute.xlu1 %v358_v12  ;;  %279 = vset.pattern.permute.xlu0 %v359_v13  ;;  %v98_v41 = vld [vmem:[#allocation5] sm:$0xff]  ;;  %v224_v9 = vld [vmem:[%s408_s2] ss:$0 sm:$0xff] }
  0x26   :  { %50 = vperm.xlu1 %278, %v41_v2   ;;  %85 = vperm.xlu0 %279, %v41_v2  }
  0x27   :  { %231 = vmatprep.subr.mxu0 %v126_v11 }
  0x28   :  { %232 = vmatpush3.msra.mxu0 %v110_v14 }
  0x29   :  { %233 = vmatprep.subr.mxu0 %v125_v15 }
  0x2a   :  { %280 = vset.pattern.permute.xlu1 %v360_v17  ;;  %282 = vset.pattern.permute.xlu0 %v361_v18 }
  0x2b   :  { %56 = vperm.xlu1 %280, %v41_v2   ;;  %62 = vperm.xlu0 %282, %v41_v2  }
  0x2c   :  { %234 = vmatpush3.msra.mxu0 %v109_v16 }
  0x2d   :  { %235 = vmatprep.subr.mxu0 %v124_v19 }
  0x2e   :  { %236 = vmatpush3.msra.mxu0 %v108_v20 }
  0x2f   :  { %281 = vset.pattern.permute.xlu1 %v362_v24  ;;  %237 = vmatprep.subr.mxu0 %v123_v21 }
  0x30   :  { %91 = vperm.xlu1 %281, %v41_v2   ;;  %238 = vmatpush3.msra.mxu0 %v107_v22 }
  0x31   :  { %239 = vmatprep.subr.mxu0 %v122_v23  ;;  %283 = vset.pattern.permute.xlu0 %v362_v24 }
  0x32   :  { %240 = vmatpush3.msra.mxu0 %v106_v25 }
  0x33   :  { %241 = vmatprep.subr.mxu0 %v121_v26 }
  0x34   :  { %242 = vmatpush3.msra.mxu0 %v105_v27 }
  0x35   :  { %243 = vmatprep.subr.mxu0 %v120_v28 }
  0x36   :  { %244 = vmatpush3.msra.mxu0 %v104_v29 }
  0x37   :  { %245 = vmatprep.subr.mxu0 %v119_v30 }
  0x38   :  { %246 = vmatpush3.msra.mxu0 %v103_v31 }
  0x39   :  { %247 = vmatprep.subr.mxu0 %v118_v32 }
  0x3a   :  { %248 = vmatpush3.msra.mxu0 %v102_v33 }
  0x3b   :  { %249 = vmatprep.subr.mxu0 %v117_v34 }
  0x3c   :  { %250 = vmatpush3.msra.mxu0 %v101_v35 }
  0x3d   :  { %251 = vmatprep.subr.mxu0 %v116_v36 }
  0x3e   :  { %252 = vmatpush3.msra.mxu0 %v100_v37 }
  0x3f   :  { %253 = vmatprep.subr.mxu0 %v115_v38 }
  0x40   :  { %254 = vmatpush3.msra.mxu0 %v99_v39 }
  0x41   :  { %255 = vmatprep.subr.mxu0 %v114_v40 }
  0x42   :  { %256 = vmatpush3.msra.mxu0 %v98_v41 }
  0x97   :  { %v80_v42 = vpop.permute.xlu1 %79  ;;  %v69_v43 = vpop.permute.xlu0 %68 }
  0x98   :  { %vm70_vm0 = vcmp.eq.s32.totalorder %v43_v45, %v69_v43  ;;  %vm81_vm4 = vcmp.eq.s32.totalorder %v43_v45, %v80_v42 }
  0x99   :  { %v71_v48 = vsel %vm70_vm0, 1, %v356_v7  ;;  %v82_v57 = vsel %vm81_vm4, 1, %v356_v7 }
  0x9c   :  { %v46_v46 = vpop.permute.xlu1 %45  ;;  %v74_v47 = vpop.permute.xlu0 %73 }
  0x9d   :  { %vm75_vm1 = vcmp.eq.s32.totalorder %v43_v45, %v74_v47  ;;  %vm47_vm3 = vcmp.eq.s32.totalorder %v43_v45, %v46_v46 }
  0x9e   :  { %v76_v49 = vsel %vm75_vm1, 1, %v356_v7  ;;  %v48_v54 = vsel %vm47_vm3, 1, %v356_v7 }
  0x9f   :  { %v77_v52 = vadd.s32 %v76_v49, %v71_v48 }
  0xa1   :  { %v51_v50 = vpop.permute.xlu1 %50  ;;  %v86_v51 = vpop.permute.xlu0 %85  ;;  %v83_v60 = vadd.s32 %v82_v57, %v77_v52 }
  0xa2   :  { %vm52_vm2 = vcmp.eq.s32.totalorder %v43_v45, %v51_v50  ;;  %vm87_vm5 = vcmp.eq.s32.totalorder %v43_v45, %v86_v51 }
  0xa3   :  { %v53_v53 = vsel %vm52_vm2, 1, %v356_v7  ;;  %v88_v61 = vsel %vm87_vm5, 1, %v356_v7 }
  0xa4   :  { %v54_v58 = vadd.s32 %v53_v53, %v48_v54  ;;  %v89_v1 = vadd.s32 %v88_v61, %v83_v60 }
  0xa6   :  { %v57_v55 = vpop.permute.xlu1 %56  ;;  %v63_v56 = vpop.permute.xlu0 %62 }
  0xa7   :  { %vm58_vm6 = vcmp.eq.s32.totalorder %v43_v45, %v57_v55  ;;  %vm64_vm7 = vcmp.eq.s32.totalorder %v43_v45, %v63_v56 }
  0xa8   :  { %v59_v59 = vsel %vm58_vm6, 1, %v356_v7  ;;  %v65_v63 = vsel %vm64_vm7, 1, %v356_v7 }
  0xa9   :  { %v60_v62 = vadd.s32 %v59_v59, %v54_v58 }
  0xab   :  { %v92_v0 = vpop.permute.xlu1 %91  ;;  %v66_v2 = vadd.s32 %v65_v63, %v60_v62 }
  0xac   :  { %vm93_vm8 = vcmp.eq.s32.totalorder %v43_v45, %v92_v0 }
  0xad   :  { %v94_v3 = vsel %vm93_vm8, 1, %v356_v7  ;;  %v96_v6 = vcvt.s32.f32 %v66_v2 }
  0xae   :  { %v95_v4 = vadd.s32 %v94_v3, %v89_v1 }
  0xb0   :  { %v97_v5 = vcvt.s32.f32 %v95_v4 }
  0xb2   :  { %201 = vmatprep.mubr.f32.mxu0 %v97_v5 }
  0xb3   :  { %202 = vmatmul.mubr.f32.vlgmr.msra.gmra.mxu0 %v96_v6 }
 0x173   :  { %v257_v8 = vpop.f32.mrf.mxu0 }
 0x175   :  { %v258_v10 = vpop.f32.mrf.mxu0 }
 0x176   :  { %v259_v11 = vadd.f32 %v258_v10, %v257_v8 }
 0x178   :  { %v204_v12 = vadd.f32 %v259_v11, %v224_v9 }
 0x17a   :  { %207 = vst [vmem:[#allocation7] sm:$0xff] %v204_v12 }
 0x17b   :  { %335 = shalt.err (!%p332_p0)
}
 0x17c   :  { %217 = dma.vmem_to_hbm [thread:$0]  %s215_s25, 128, %s409_s3, [#allocation4]  }
 0x17d   :  { %348 = dma.done.wait [#allocation4], 128  }
 0x17e   :  { %349 = vsyncadd [#allocation4], 4294967168 }
 0x17f   :  { %221 = vsyncpa [#allocation3], 1 }
 0x180   :  { %222 = vsyncpa [#allocation6], 1 }
 0x181   :  { %223 = vsyncpa [#allocation4], 1 }

</bundles_post_ra>
